<compile_context>
chip_gen: v7x
topology: tpu7x:2x2x1
jax: 0.10.0
libtpu: 0.0.40
codegen_flags: <defaults>
</compile_context>

<pallas_src>
import functools

import jax
import jax.numpy as jnp
from jax.experimental import pallas as pl
from jax.experimental.pallas import tpu as pltpu

HIDDEN = 128
LANE = 128  # padded width of the action head (lane-dense output)


# --------------------------------------------------------------------------
# Kernel bodies
# --------------------------------------------------------------------------
def _q_values(x_ref, w1_ref, b1_ref, w2_ref, b2_ref, w3_ref, b3_ref):
    """Shared body: returns Q values [TB, LANE] in f32 (lane-padded head)."""
    w_dtype = w2_ref.dtype                       # f32 or bf16 weights
    x = x_ref[...].astype(w_dtype)               # [TB, n_obs]

    # ---- layer 1 + ReLU: K = n_obs (tiny) matmul on the otherwise-idle MXU,
    # f32 accumulation; bias add / ReLU stay f32 on the VPU. ----
    h = jnp.dot(x, w1_ref[...], preferred_element_type=jnp.float32)
    h = jnp.maximum(h + b1_ref[...].astype(jnp.float32), 0.0)

    # ---- layer 2 + ReLU: 128x128 MXU matmul ----
    h = jnp.dot(h.astype(w_dtype), w2_ref[...], preferred_element_type=jnp.float32)
    h = jnp.maximum(h + b2_ref[...].astype(jnp.float32), 0.0)

    # ---- layer 3: lane-dense (weights zero-padded to 128 output columns) ----
    q = jnp.dot(h.astype(w_dtype), w3_ref[...], preferred_element_type=jnp.float32)
    return q + b3_ref[...].astype(jnp.float32)   # [TB, LANE] f32


def dqn_q_kernel(x_ref, w1_ref, b1_ref, w2_ref, b2_ref, w3_ref, b3_ref, out_ref):
    q = _q_values(x_ref, w1_ref, b1_ref, w2_ref, b2_ref, w3_ref, b3_ref)
    out_ref[...] = q.astype(out_ref.dtype)


def dqn_greedy_kernel(n_actions, x_ref, w1_ref, b1_ref, w2_ref, b2_ref,
                      w3_ref, b3_ref, out_ref):
    """Fused Q + argmax over the first n_actions lanes (pad lanes masked)."""
    q = _q_values(x_ref, w1_ref, b1_ref, w2_ref, b2_ref, w3_ref, b3_ref)
    col = jax.lax.broadcasted_iota(jnp.int32, q.shape, 1)
    qm = jnp.where(col < n_actions, q, -jnp.inf)            # pad lanes can't win
    best = jnp.max(qm, axis=-1, keepdims=True)
    idx = jnp.min(jnp.where(qm >= best, col, LANE), axis=-1, keepdims=True)
    out_ref[...] = idx.astype(jnp.int32)                    # first-argmax tiebreak


# --------------------------------------------------------------------------
# Host-side helpers / wrappers
# --------------------------------------------------------------------------
def _round_up(x, m):
    return (x + m - 1) // m * m


def _auto_tile(B):
    """Large batch tile (amortize per-step overhead) with >= 2 grid steps
    so v7x's second TensorCore has work under the 'parallel' axis."""
    tb = min(1024, _round_up(pl.cdiv(B, 2), 128))
    return max(128, tb)


def _vmem_limit(B, params):
    """VMEM budget for the ungridded path as a function of batch size."""
    param_bytes = sum(int(p.size) * jnp.dtype(p.dtype).itemsize for p in params)
    act_bytes = 6 * B * LANE * 4            # x, h1, h2, q, out + slack (f32)
    return int(min(2 * (param_bytes + act_bytes) + (2 << 20), 96 << 20))


def dqn_forward(x, params, n_actions, *, block_b="auto", out_dtype=None):
    """x: [B, n_obs] f32 -> [B, n_actions] Q-values.

    Small batches (action selection): single ungridded call, everything VMEM
    resident, f32 output.  Large batches (replay forward): gridded over the
    batch with a large tile (>= 2 grid steps), weights resident across steps,
    bf16 output by default to halve the padded-slab writeback.
    """
    w1, b1, w2, b2, w3p, b3p = params            # w3p/b3p already lane-padded
    B, n_obs = x.shape

    ungridded = (
        block_b is None
        or (block_b == "auto" and B <= 256)
        or (isinstance(block_b, int) and B <= block_b)
    )

    if ungridded:
        odt = jnp.float32 if out_dtype is None else out_dtype
        vmem = pltpu.MemorySpace.VMEM
        full = lambda: pl.BlockSpec(memory_space=vmem)
        out_pad = pl.pallas_call(
            dqn_q_kernel,
            out_shape=jax.ShapeDtypeStruct((B, LANE), odt),
            in_specs=[full() for _ in range(7)],
            out_specs=full(),
            compiler_params=pltpu.CompilerParams(
                vmem_limit_bytes=_vmem_limit(B, params)),
        )(x, w1, b1, w2, b2, w3p, b3p)
        return out_pad[:, :n_actions]

    # ---- gridded, auto-pipelined replay path ----
    odt = jnp.bfloat16 if out_dtype is None else out_dtype
    TB = _auto_tile(B) if block_b == "auto" else _round_up(int(block_b), 128)
    B_pad = pl.cdiv(B, TB) * TB
    if B_pad != B:
        x = jnp.pad(x, ((0, B_pad - B), (0, 0)))   # pad rows sliced away below

    resident = lambda arr: pl.BlockSpec(arr.shape, lambda i: (0, 0))
    out_pad = pl.pallas_call(
        dqn_q_kernel,
        out_shape=jax.ShapeDtypeStruct((B_pad, LANE), odt),
        grid=(B_pad // TB,),
        in_specs=[
            pl.BlockSpec((TB, n_obs), lambda i: (i, 0)),     # x tile
            resident(w1), resident(b1),
            resident(w2), resident(b2),
            resident(w3p), resident(b3p),
        ],
        out_specs=pl.BlockSpec((TB, LANE), lambda i: (i, 0)),
        compiler_params=pltpu.CompilerParams(
            dimension_semantics=("parallel",)),               # megacore on v7x
    )(x, w1, b1, w2, b2, w3p, b3p)
    return out_pad[:B, :n_actions]


def dqn_greedy_action(x, params, n_actions):
    """Per-env-step action selection: fused Q + argmax, one dispatch.
    Returns int32 [B] greedy actions."""
    # TODO(synk): P10 cross-call weight residency (a 'load weights' pallas_call
    # returning a VMEM ref + DMA semaphore consumed each env step) would remove
    # the repeated ~66-132 KB weight DMA on this latency-bound path.
    w1, b1, w2, b2, w3p, b3p = params
    B, _ = x.shape
    vmem = pltpu.MemorySpace.VMEM
    full = lambda: pl.BlockSpec(memory_space=vmem)
    actions = pl.pallas_call(
        functools.partial(dqn_greedy_kernel, n_actions),
        out_shape=jax.ShapeDtypeStruct((B, 1), jnp.int32),
        in_specs=[full() for _ in range(7)],
        out_specs=full(),
        compiler_params=pltpu.CompilerParams(
            vmem_limit_bytes=_vmem_limit(B, params)),
    )(x, w1, b1, w2, b2, w3p, b3p)
    return actions[:, 0]


def init_params(key, n_observations, n_actions):
    """PyTorch-nn.Linear-style init; weights stored [in, out]; head lane-padded.
    Returns (padded f32 params for the kernel, unpadded f32 reference params)."""
    k1, k2, k3, k4, k5, k6 = jax.random.split(key, 6)

    def uniform(k, shape, fan_in):
        bound = 1.0 / jnp.sqrt(jnp.float32(fan_in))
        return jax.random.uniform(k, shape, jnp.float32, -bound, bound)

    w1 = uniform(k1, (n_observations, HIDDEN), n_observations)
    b1 = uniform(k2, (1, HIDDEN), n_observations)
    w2 = uniform(k3, (HIDDEN, HIDDEN), HIDDEN)
    b2 = uniform(k4, (1, HIDDEN), HIDDEN)
    w3 = uniform(k5, (HIDDEN, n_actions), HIDDEN)
    b3 = uniform(k6, (1, n_actions), HIDDEN)

    # Zero-pad the action head to a lane-dense 128-wide output.  Pad columns
    # are only safe because wrappers slice [:, :n_actions] / mask before argmax.
    w3p = jnp.zeros((HIDDEN, LANE), jnp.float32).at[:, :n_actions].set(w3)
    b3p = jnp.zeros((1, LANE), jnp.float32).at[:, :n_actions].set(b3)
    return (w1, b1, w2, b2, w3p, b3p), (w1, b1, w2, b2, w3, b3)


def cast_weights(params, dtype):
    """Cast weights (not biases) — bf16 is MXU-native on v5e/v6e/v7x and
    halves weight DMA; accumulation stays f32 in the kernel."""
    w1, b1, w2, b2, w3p, b3p = params
    return (w1.astype(dtype), b1, w2.astype(dtype), b2, w3p.astype(dtype), b3p)


def _reference(x, ref_params):
    w1, b1, w2, b2, w3, b3 = ref_params
    h1 = jnp.maximum(x @ w1 + b1, 0.0)
    h2 = jnp.maximum(h1 @ w2 + b2, 0.0)
    return h2 @ w3 + b3


if __name__ == "__main__":
    n_observations = 4   # CartPole-v1 state dim
    n_actions = 2        # CartPole-v1 action dim

    key = jax.random.PRNGKey(0)
    kx, kp, kb = jax.random.split(key, 3)
    params_f32, ref_params = init_params(kp, n_observations, n_actions)
    params_bf16 = cast_weights(params_f32, jnp.bfloat16)   # recommended default

    # --- small-batch (action-selection) path, f32 weights, exact check ---
    batch = 8
    x = jax.random.normal(kx, (batch, n_observations), jnp.float32)
    ref = _reference(x, ref_params)

    out_f32 = dqn_forward(x, params_f32, n_actions)
    jax.block_until_ready(out_f32)
    assert out_f32.shape == (batch, n_actions)
    assert jnp.allclose(out_f32, ref, atol=1e-5, rtol=1e-5)

    # --- small-batch path with bf16 weights (the recommended default) ---
    out_bf16 = dqn_forward(x, params_bf16, n_actions)
    jax.block_until_ready(out_bf16)
    assert jnp.allclose(out_bf16, ref, atol=2e-2, rtol=2e-2)

    # --- fused greedy-action kernel vs argmax of the kernel's own Q values ---
    actions = dqn_greedy_action(x, params_f32, n_actions)
    jax.block_until_ready(actions)
    assert actions.shape == (batch,)
    assert jnp.all(actions == jnp.argmax(out_f32, axis=-1))

    # --- replay-batch path, f32 weights + f32 output, explicit tile, exact ---
    big_batch = 640  # not a multiple of the tile -> exercises internal padding
    xb = jax.random.normal(kb, (big_batch, n_observations), jnp.float32)
    ref_big = _reference(xb, ref_params)

    out_big_f32 = dqn_forward(xb, params_f32, n_actions,
                              block_b=256, out_dtype=jnp.float32)
    jax.block_until_ready(out_big_f32)
    assert out_big_f32.shape == (big_batch, n_actions)
    assert jnp.allclose(out_big_f32, ref_big, atol=1e-5, rtol=1e-5)

    # --- replay-batch path, defaults: auto tile (>=2 grid steps), bf16 weights
    #     and bf16 output (halved writeback) ---
    out_big = dqn_forward(xb, params_bf16, n_actions)
    jax.block_until_ready(out_big)
    assert out_big.shape == (big_batch, n_actions)
    assert out_big.dtype == jnp.bfloat16
    assert jnp.allclose(out_big.astype(jnp.float32), ref_big, atol=3e-2, rtol=3e-2)

    print("KERNEL_OK")
</pallas_src>

<mosaic_0001>
module attributes {stable_mosaic.version = 11 : i64} {
  func.func @dqn_q_kernel(%arg0: memref<8x4xf32, #tpu.memory_space<vmem>>, %arg1: memref<4x128xf32, #tpu.memory_space<vmem>>, %arg2: memref<1x128xf32, #tpu.memory_space<vmem>>, %arg3: memref<128x128xf32, #tpu.memory_space<vmem>>, %arg4: memref<1x128xf32, #tpu.memory_space<vmem>>, %arg5: memref<128x128xf32, #tpu.memory_space<vmem>>, %arg6: memref<1x128xf32, #tpu.memory_space<vmem>>, %arg7: memref<8x128xf32, #tpu.memory_space<vmem>>) attributes {dimension_semantics = [], scalar_prefetch = 0 : i64, scratch_operands = 0 : i64, tpu.core_type = #tpu.core_type<tc>} {
    %c0 = arith.constant 0 : index
    %c0_0 = arith.constant 0 : index
    %0 = vector.load %arg0[%c0, %c0_0] : memref<8x4xf32, #tpu.memory_space<vmem>>, vector<8x4xf32>
    %c0_1 = arith.constant 0 : index
    %c0_2 = arith.constant 0 : index
    %1 = vector.load %arg1[%c0_1, %c0_2] : memref<4x128xf32, #tpu.memory_space<vmem>>, vector<4x128xf32>
    %cst = arith.constant dense<0.000000e+00> : vector<8x128xf32>
    %2 = tpu.matmul %0, %1, %cst {dimension_numbers = #tpu.dot_dimension_numbers<[1], [0], [0], [1], [0, 0, 1, 1], [], []>} : vector<8x4xf32>, vector<4x128xf32>, vector<8x128xf32> -> vector<8x128xf32>
    %c0_3 = arith.constant 0 : index
    %c0_4 = arith.constant 0 : index
    %3 = vector.load %arg2[%c0_3, %c0_4] : memref<1x128xf32, #tpu.memory_space<vmem>>, vector<1x128xf32>
    %4 = vector.broadcast %3 : vector<1x128xf32> to vector<8x128xf32>
    %5 = arith.addf %2, %4 : vector<8x128xf32>
    %cst_5 = arith.constant 0.000000e+00 : f32
    %6 = vector.broadcast %cst_5 : f32 to vector<8x128xf32>
    %7 = arith.maximumf %5, %6 : vector<8x128xf32>
    %c0_6 = arith.constant 0 : index
    %c0_7 = arith.constant 0 : index
    %8 = vector.load %arg3[%c0_6, %c0_7] : memref<128x128xf32, #tpu.memory_space<vmem>>, vector<128x128xf32>
    %cst_8 = arith.constant dense<0.000000e+00> : vector<8x128xf32>
    %9 = tpu.matmul %7, %8, %cst_8 {dimension_numbers = #tpu.dot_dimension_numbers<[1], [0], [0], [1], [0, 0, 1, 1], [], []>} : vector<8x128xf32>, vector<128x128xf32>, vector<8x128xf32> -> vector<8x128xf32>
    %c0_9 = arith.constant 0 : index
    %c0_10 = arith.constant 0 : index
    %10 = vector.load %arg4[%c0_9, %c0_10] : memref<1x128xf32, #tpu.memory_space<vmem>>, vector<1x128xf32>
    %11 = vector.broadcast %10 : vector<1x128xf32> to vector<8x128xf32>
    %12 = arith.addf %9, %11 : vector<8x128xf32>
    %cst_11 = arith.constant 0.000000e+00 : f32
    %13 = vector.broadcast %cst_11 : f32 to vector<8x128xf32>
    %14 = arith.maximumf %12, %13 : vector<8x128xf32>
    %c0_12 = arith.constant 0 : index
    %c0_13 = arith.constant 0 : index
    %15 = vector.load %arg5[%c0_12, %c0_13] : memref<128x128xf32, #tpu.memory_space<vmem>>, vector<128x128xf32>
    %cst_14 = arith.constant dense<0.000000e+00> : vector<8x128xf32>
    %16 = tpu.matmul %14, %15, %cst_14 {dimension_numbers = #tpu.dot_dimension_numbers<[1], [0], [0], [1], [0, 0, 1, 1], [], []>} : vector<8x128xf32>, vector<128x128xf32>, vector<8x128xf32> -> vector<8x128xf32>
    %c0_15 = arith.constant 0 : index
    %c0_16 = arith.constant 0 : index
    %17 = vector.load %arg6[%c0_15, %c0_16] : memref<1x128xf32, #tpu.memory_space<vmem>>, vector<1x128xf32>
    %18 = vector.broadcast %17 : vector<1x128xf32> to vector<8x128xf32>
    %19 = arith.addf %16, %18 : vector<8x128xf32>
    %c0_17 = arith.constant 0 : index
    %c0_18 = arith.constant 0 : index
    %20 = vector.load %arg7[%c0_17, %c0_18] : memref<8x128xf32, #tpu.memory_space<vmem>>, vector<8x128xf32>
    tpu.vector_store %arg7[%c0_17, %c0_18], %19 {strides = array<i32>} : memref<8x128xf32, #tpu.memory_space<vmem>>, vector<8x128xf32>,
    return
  }
}

</mosaic_0001>

<bundles_post_ra>
// kernel: tpu_custom_call.1
= control target key start
LH: loop header
LB: loop body
LE: loop exit
PB: predicated region body
PF: predicated region fallthrough
CT: control target
= control target key end

     0   :  { %12 = vsyncpa [#allocation3], 0  ;;  %s709_s0 = inlined_call_operand.vmem [shape: f32[8,4], index: 0, kind: input, shape index: {}]   ;;  %s710_s1 = inlined_call_operand.vmem [shape: f32[4,128], index: 1, kind: input, shape index: {}]   ;;  %s711_s2 = inlined_call_operand.vmem [shape: f32[1,128], index: 2, kind: input, shape index: {}]   ;;  %s712_s3 = inlined_call_operand.hbm [shape: f32[128,128], index: 3, kind: input, shape index: {}]   ;;  %s713_s4 = inlined_call_operand.vmem [shape: f32[1,128], index: 4, kind: input, shape index: {}]   ;;  %s714_s5 = inlined_call_operand.hbm [shape: f32[128,128], index: 5, kind: input, shape index: {}]   ;;  %s715_s6 = inlined_call_operand.vmem [shape: f32[1,128], index: 6, kind: input, shape index: {}]   ;;  %s716_s7 = inlined_call_operand.hbm [shape: f32[8,128], index: 7, kind: output, shape index: {}]  }
   0x1   :  { %13 = vsyncpa [#allocation6], 0 }
   0x2   :  { %14 = vsyncpa [#allocation4], 0  ;;  %s591_s24 = smov [#allocation2]   ;;  %s519_s28 = scalar_lea.hbm %s712_s3, 2048 }
   0x3   :  { %s26_s25 = sshll.u32 %s591_s24, 4  ;;  %p520_p0 = scmp.ne.s32.totalorder %s712_s3, %s519_s28  ;;  %s27_s25 = int_to_ptr.vmem [resolvable:$true] %s26_s25 }
   0x4   :  { %p523_p1 = scmp.lt.u32.totalorder %s519_s28, %s712_s3 }
   0x6   :  { %p525_p2 = pnand %p523_p1, %p520_p0 }
   0x8   :  { %528 = shalt.err (!%p525_p2)
}
   0x9   :  { %s529_s10 = scalar_lea.vmem %s27_s25, 2048  ;;  %p534_p4 = scmp.lt.s32.totalorder %s27_s25, %s27_s25 }
   0xa   :  { %p530_p3 = scmp.ne.s32.totalorder %s27_s25, %s529_s10  ;;  %p535_p5 = scmp.lt.s32.totalorder %s529_s10, %s529_s10 }
   0xc   :  { %p536_p6 = por %p535_p5, %p534_p4 }
   0xe   :  { %p537_p7 = pnand %p536_p6, %p530_p3 }
  0x10   :  { %540 = shalt.err (!%p537_p7)
}
  0x11   :  { %s592_s11 = smov 128   ;;  %s593_s12 = smov 8  }
  0x12   :  { %32 = dma.hbm_to_vmem [thread:$0]  %s712_s3, 2048, %s27_s25, [#allocation3], %s592_s11, %s592_s11, %s593_s12  }
  0x13   :  { %s594_s15 = smov [#allocation5]   ;;  %s541_s19 = scalar_lea.hbm %s714_s5, 2048 }
  0x14   :  { %s40_s16 = sshll.u32 %s594_s15, 4  ;;  %p542_p8 = scmp.ne.s32.totalorder %s714_s5, %s541_s19  ;;  %s41_s16 = int_to_ptr.vmem [resolvable:$true] %s40_s16 }
  0x15   :  { %p545_p9 = scmp.lt.u32.totalorder %s541_s19, %s714_s5 }
  0x17   :  { %p547_p10 = pnand %p545_p9, %p542_p8 }
  0x19   :  { %550 = shalt.err (!%p547_p10)
}
  0x1a   :  { %s551_s24 = scalar_lea.vmem %s41_s16, 2048  ;;  %p556_p12 = scmp.lt.s32.totalorder %s41_s16, %s41_s16 }
  0x1b   :  { %p552_p11 = scmp.ne.s32.totalorder %s41_s16, %s551_s24  ;;  %p557_p13 = scmp.lt.s32.totalorder %s551_s24, %s551_s24 }
  0x1d   :  { %p558_p0 = por %p557_p13, %p556_p12 }
  0x1f   :  { %p559_p1 = pnand %p558_p0, %p552_p11 }
  0x21   :  { %562 = shalt.err (!%p559_p1)
}
  0x22   :  { %46 = dma.hbm_to_vmem [thread:$0]  %s714_s5, 2048, %s41_s16, [#allocation6], %s592_s11, %s592_s11, %s593_s12  }
  0x23   :  { %585 = dma.done.wait [#allocation3], 2048  }
  0x24   :  { %586 = vsyncadd [#allocation3], 4294965248 }
  0x25   :  { %587 = dma.done.wait [#allocation6], 2048  }
  0x26   :  { %588 = vsyncadd [#allocation6], 4294965248  ;;  %v595_v0 = vmov 0.0   ;;  %vm596_vm0 = vmmov 0   ;;  %v597_v1 = vmov 0.0|0.0   ;;  %vm68_vm1 = vcmask 1043456  }
  0x27   :  { %388 = vmatprep.subr.mxu0 %v595_v0  ;;  %390 = vmatprep.mubr.msk.f32.mxu0 %vm596_vm0, %v595_v0  ;;  %vm64_vm2 = vcmask 31744   ;;  %v56_v2 = vld [vmem:[%s710_s1] sm:$0xf]  ;;  %v144_v5 = vld [vmem:[#allocation2 + $0x8] sm:$0xff]  ;;  %v145_v6 = vld [vmem:[#allocation2 + $0x10] sm:$0xff]  ;;  %s598_s9 = smov [#allocation7]  }
  0x28   :  { %463 = vmatprep.subr.bf16.mxu1 %v597_v1  ;;  %425 = vmatprep.mubr.msk.f32.mxu1 %vm596_vm0, %v595_v0  ;;  %v55_v3 = vld [vmem:[%s709_s0] sm:$0xff]  ;;  %v146_v7 = vld [vmem:[#allocation2 + $0x18] sm:$0xff]  ;;  %v148_v11 = vld [vmem:[#allocation2 + $0x28] sm:$0xff]  ;;  %s337_s10 = sshll.u32 %s598_s9, 4  ;;  %s338_s10 = int_to_ptr.vmem [resolvable:$true] %s337_s10 }
  0x29   :  { %v143_v4 = vld [vmem:[#allocation2] sm:$0xff]  ;;  %389 = vmatpush3.msk.msra.mxu0 %vm68_vm1, %v56_v2  ;;  %v467_v9 = vpack.c.bf16 %v146_v7, %v145_v6  ;;  %v149_v13 = vld [vmem:[#allocation2 + $0x30] sm:$0xff]  ;;  %v150_v14 = vld [vmem:[#allocation2 + $0x38] sm:$0xff]  ;;  %s563_s11 = scalar_lea.vmem %s338_s10, 128  ;;  %p568_p3 = scmp.lt.s32.totalorder %s338_s10, %s338_s10 }
  0x2a   :  { %391 = vmatmul.mubr.msk.f32.vlgmr.msra.gmra.mrb[0].mxu0 %vm64_vm2, %v55_v3  ;;  %v464_v8 = vpack.c.bf16 %v144_v5, %v143_v4  ;;  %487 = vmatprep.subr.bf16.mxu0 %v597_v1  ;;  %v147_v10 = vld [vmem:[#allocation2 + $0x20] sm:$0xff]  ;;  %v473_v15 = vpack.c.bf16 %v150_v14, %v149_v13  ;;  %v152_v17 = vld [vmem:[#allocation2 + $0x48] sm:$0xff]  ;;  %v153_v19 = vld [vmem:[#allocation2 + $0x50] sm:$0xff]  ;;  %p564_p2 = scmp.ne.s32.totalorder %s338_s10, %s563_s11  ;;  %p569_p4 = scmp.lt.s32.totalorder %s563_s11, %s563_s11 }
  0x2b   :  { %460 = vmatprep.mubr.msk.f32.mxu0 %vm596_vm0, %v595_v0  ;;  %v470_v12 = vpack.c.bf16 %v148_v11, %v147_v10  ;;  %v151_v16 = vld [vmem:[#allocation2 + $0x40] sm:$0xff]  ;;  %v154_v20 = vld [vmem:[#allocation2 + $0x58] sm:$0xff]  ;;  %v156_v23 = vld [vmem:[#allocation2 + $0x68] sm:$0xff] }
  0x2c   :  { %465 = vmatpush3.bf16.msra.mxu1 %v464_v8  ;;  %v476_v18 = vpack.c.bf16 %v152_v17, %v151_v16  ;;  %v479_v21 = vpack.c.bf16 %v154_v20, %v153_v19  ;;  %v155_v22 = vld [vmem:[#allocation2 + $0x60] sm:$0xff]  ;;  %v157_v25 = vld [vmem:[#allocation2 + $0x70] sm:$0xff]  ;;  %v158_v26 = vld [vmem:[#allocation2 + $0x78] sm:$0xff]  ;;  %p570_p5 = por %p569_p4, %p568_p3 }
  0x2d   :  { %466 = vmatprep.subr.bf16.mxu1 %v597_v1  ;;  %v482_v24 = vpack.c.bf16 %v156_v23, %v155_v22  ;;  %v485_v27 = vpack.c.bf16 %v158_v26, %v157_v25  ;;  %v237_v28 = vld [vmem:[#allocation5] sm:$0xff]  ;;  %v238_v29 = vld [vmem:[#allocation5 + $0x8] sm:$0xff]  ;;  %v239_v30 = vld [vmem:[#allocation5 + $0x10] sm:$0xff] }
  0x2e   :  { %v488_v31 = vpack.c.bf16 %v238_v29, %v237_v28  ;;  %v240_v32 = vld [vmem:[#allocation5 + $0x18] sm:$0xff]  ;;  %v241_v34 = vld [vmem:[#allocation5 + $0x20] sm:$0xff]  ;;  %v242_v35 = vld [vmem:[#allocation5 + $0x28] sm:$0xff]  ;;  %p571_p6 = pnand %p570_p5, %p564_p2 }
  0x2f   :  { %v491_v33 = vpack.c.bf16 %v240_v32, %v239_v30  ;;  %v494_v36 = vpack.c.bf16 %v242_v35, %v241_v34  ;;  %v243_v37 = vld [vmem:[#allocation5 + $0x30] sm:$0xff]  ;;  %v244_v38 = vld [vmem:[#allocation5 + $0x38] sm:$0xff]  ;;  %v245_v40 = vld [vmem:[#allocation5 + $0x40] sm:$0xff] }
  0x30   :  { %468 = vmatpush3.bf16.msra.mxu1 %v467_v9  ;;  %489 = vmatpush3.bf16.msra.mxu0 %v488_v31  ;;  %v497_v39 = vpack.c.bf16 %v244_v38, %v243_v37  ;;  %v246_v41 = vld [vmem:[#allocation5 + $0x48] sm:$0xff]  ;;  %v247_v43 = vld [vmem:[#allocation5 + $0x50] sm:$0xff]  ;;  %v248_v44 = vld [vmem:[#allocation5 + $0x58] sm:$0xff] }
  0x31   :  { %469 = vmatprep.subr.bf16.mxu1 %v597_v1  ;;  %490 = vmatprep.subr.bf16.mxu0 %v597_v1  ;;  %v500_v42 = vpack.c.bf16 %v246_v41, %v245_v40  ;;  %v503_v45 = vpack.c.bf16 %v248_v44, %v247_v43  ;;  %v249_v46 = vld [vmem:[#allocation5 + $0x60] sm:$0xff]  ;;  %v250_v47 = vld [vmem:[#allocation5 + $0x68] sm:$0xff]  ;;  %v251_v54 = vld [vmem:[#allocation5 + $0x70] sm:$0xff] }
  0x32   :  { %v506_v48 = vpack.c.bf16 %v250_v47, %v249_v46  ;;  %v347_v49 = vld [vmem:[%s711_s2] ss:$0 sm:$0xff]  ;;  %v252_v55 = vld [vmem:[#allocation5 + $0x78] sm:$0xff] }
  0x33   :  { %v509_v56 = vpack.c.bf16 %v252_v55, %v251_v54  ;;  %v350_v57 = vld [vmem:[%s713_s4] ss:$0 sm:$0xff] }
  0x34   :  { %471 = vmatpush3.bf16.msra.mxu1 %v470_v12  ;;  %492 = vmatpush3.bf16.msra.mxu0 %v491_v33  ;;  %v351_v62 = vld [vmem:[%s715_s6] ss:$0 sm:$0xff] }
  0x35   :  { %472 = vmatprep.subr.bf16.mxu1 %v597_v1  ;;  %493 = vmatprep.subr.bf16.mxu0 %v597_v1 }
  0x38   :  { %474 = vmatpush3.bf16.msra.mxu1 %v473_v15  ;;  %495 = vmatpush3.bf16.msra.mxu0 %v494_v36 }
  0x39   :  { %475 = vmatprep.subr.bf16.mxu1 %v597_v1  ;;  %496 = vmatprep.subr.bf16.mxu0 %v597_v1 }
  0x3c   :  { %477 = vmatpush3.bf16.msra.mxu1 %v476_v18  ;;  %498 = vmatpush3.bf16.msra.mxu0 %v497_v39 }
  0x3d   :  { %478 = vmatprep.subr.bf16.mxu1 %v597_v1  ;;  %499 = vmatprep.subr.bf16.mxu0 %v597_v1 }
  0x40   :  { %480 = vmatpush3.bf16.msra.mxu1 %v479_v21  ;;  %501 = vmatpush3.bf16.msra.mxu0 %v500_v42 }
  0x41   :  { %481 = vmatprep.subr.bf16.mxu1 %v597_v1  ;;  %502 = vmatprep.subr.bf16.mxu0 %v597_v1 }
  0x44   :  { %483 = vmatpush3.bf16.msra.mxu1 %v482_v24  ;;  %504 = vmatpush3.bf16.msra.mxu0 %v503_v45 }
  0x45   :  { %484 = vmatprep.subr.bf16.mxu1 %v597_v1  ;;  %505 = vmatprep.subr.bf16.mxu0 %v597_v1 }
  0x48   :  { %486 = vmatpush3.bf16.msra.mxu1 %v485_v27  ;;  %507 = vmatpush3.bf16.msra.mxu0 %v506_v48 }
  0x49   :  { %508 = vmatprep.subr.bf16.mxu0 %v597_v1 }
  0x4c   :  { %510 = vmatpush3.bf16.msra.mxu0 %v509_v56 }
  0xfd   :  { %v138_v50 = vpop.f32.mrb[0].mxu0 }
  0xfe   :  { %v139_v51 = vadd.f32 %v347_v49, %v138_v50  ;;  %v392_v52 = vpop.f32.mrb[1].mxu0 }
 0x100   :  { %v142_v53 = vmax.f32 %v139_v51, 0.0 }
 0x102   :  { %426 = vmatmul.mubr.f32.vlgmr.msra.gmra.mrb[0].mxu1 %v142_v53 }
 0x1d5   :  { %v232_v58 = vpop.f32.mrb[0].mxu1 }
 0x1d6   :  { %v233_v59 = vadd.f32 %v350_v57, %v232_v58  ;;  %v427_v60 = vpop.f32.mrb[1].mxu1 }
 0x1d8   :  { %v236_v61 = vmax.f32 %v233_v59, 0.0 }
 0x1da   :  { %461 = vmatmul.mubr.f32.vlgmr.msra.gmra.mrb[2].mxu0 %v236_v61 }
 0x2ad   :  { %v326_v63 = vpop.f32.mrb[2].mxu0 }
 0x2ae   :  { %v327_v0 = vadd.f32 %v351_v62, %v326_v63  ;;  %v462_v1 = vpop.f32.mrb[3].mxu0 }
 0x2b0   :  { %330 = vst [vmem:[#allocation7] sm:$0xff] %v327_v0 }
 0x2b1   :  { %574 = shalt.err (!%p571_p6)
}
 0x2b2   :  { %s575_s13 = scalar_lea.hbm %s716_s7, 128 }
 0x2b3   :  { %p576_p7 = scmp.ne.s32.totalorder %s716_s7, %s575_s13  ;;  %p579_p8 = scmp.lt.u32.totalorder %s575_s13, %s716_s7 }
 0x2b5   :  { %p581_p9 = pnand %p579_p8, %p576_p7 }
 0x2b7   :  { %584 = shalt.err (!%p581_p9)
}
 0x2b8   :  { %340 = dma.vmem_to_hbm [thread:$0]  %s338_s10, 128, %s716_s7, [#allocation4]  }
 0x2b9   :  { %589 = dma.done.wait [#allocation4], 128  }
 0x2ba   :  { %590 = vsyncadd [#allocation4], 4294967168 }
 0x2bb   :  { %344 = vsyncpa [#allocation3], 1 }
 0x2bc   :  { %345 = vsyncpa [#allocation6], 1 }
 0x2bd   :  { %346 = vsyncpa [#allocation4], 1 }

</bundles_post_ra>
